<compile_context>
chip_gen: v7x
topology: tpu7x:2x2x1
jax: 0.10.0
libtpu: 0.0.40
codegen_flags: <defaults>
</compile_context>

<pallas_src>
import functools

import jax
import jax.numpy as jnp
from jax.experimental import pallas as pl
from jax.experimental.pallas import tpu as pltpu

BN_EPS = 1e-5


def _nn_dos_kernel(layer_dims, output_dim, ipb, batch,
                   x_ref, w_ref, gb_ref, head_ref, o_ref):
    """Fused NN_DOS forward for one grid step (ipb packed instances).

    x_ref   : (input_dim, L)          activations, L = ipb*batch on lanes
    w_ref   : (n_hidden, H, K)        hidden Linear weights (zero-padded)
    gb_ref  : (2, n_hidden, H, 1)     BN gamma (index 0) / beta (index 1)
    head_ref: (K_last + 1, output_dim) output W^T stacked over bias^T
    o_ref   : (output_dim, L)
    """
    L = ipb * batch
    inv_b = 1.0 / batch

    # 0/1 segment matrices for per-instance BN under lane packing (built from
    # iota + compare; no integer division, no transposes).
    row = jax.lax.broadcasted_iota(jnp.int32, (L, ipb), 0)     # lane id
    col = jax.lax.broadcasted_iota(jnp.int32, (L, ipb), 1)     # instance id
    seg = jnp.where((row >= col * batch) & (row < (col + 1) * batch),
                    1.0, 0.0).astype(jnp.float32)              # (L, ipb)
    segi = jax.lax.broadcasted_iota(jnp.int32, (ipb, L), 0)    # instance id
    lane = jax.lax.broadcasted_iota(jnp.int32, (ipb, L), 1)    # lane id
    segT = jnp.where((lane >= segi * batch) & (lane < (segi + 1) * batch),
                     1.0, 0.0).astype(jnp.float32)             # (ipb, L)

    h = x_ref[...]                                             # (in, L)
    for li, (fi, fo) in enumerate(layer_dims):
        wall = w_ref[li]                                       # (H, K)
        w = wall[:fo, :fi]                                     # (fo, fi)
        g = gb_ref[0, li][:fo, :]                              # (fo, 1)
        be = gb_ref[1, li][:fo, :]                             # (fo, 1)

        # Linear (bias intentionally dropped: exact no-op under train-mode BN).
        z = jnp.dot(w, h, preferred_element_type=jnp.float32)  # (fo, L) MXU

        # Per-instance training-mode BN: one-pass stats via segment matmuls.
        s1 = jnp.dot(z, seg, preferred_element_type=jnp.float32)       # (fo, ipb)
        s2 = jnp.dot(z * z, seg, preferred_element_type=jnp.float32)   # (fo, ipb)
        mean = s1 * inv_b
        var = s2 * inv_b - mean * mean
        scale = g * jax.lax.rsqrt(var + BN_EPS)                        # (fo, ipb)
        shift = be - mean * scale                                      # (fo, ipb)
        # Broadcast per-instance scale/shift back onto the lane axis.
        sc = jnp.dot(scale, segT, preferred_element_type=jnp.float32)  # (fo, L)
        sh = jnp.dot(shift, segT, preferred_element_type=jnp.float32)  # (fo, L)
        h = jnp.maximum(z * sc + sh, 0.0)                              # BN + ReLU

    # Output Linear + Sigmoid.
    k_last = layer_dims[-1][1]
    if output_dim == 1:
        wcol = head_ref[:k_last, :]                            # (k_last, 1)
        bias = head_ref[k_last:k_last + 1, :]                  # (1, 1)
        logits = jnp.sum(wcol * h, axis=0, keepdims=True) + bias   # (1, L)
    else:
        # TODO(synk): output_dim > 1 path is untested at these shapes.
        logits = jax.lax.dot_general(
            head_ref[:k_last, :], h, (((0,), (0,)), ((), ())),
            preferred_element_type=jnp.float32)
        logits = logits + jnp.transpose(head_ref[k_last:k_last + 1, :])

    # Numerically-stable sigmoid: EUP exp + reciprocal, VPU select.
    e = jnp.exp(-jnp.abs(logits))
    r = pl.reciprocal(1.0 + e, approx=False)
    o_ref[...] = jnp.where(logits >= 0, r, e * r)


@functools.partial(jax.jit, static_argnames=("layer_dims",))
def nn_dos_forward(x, w_stack, gb_stack, head, *, layer_dims):
    """x: (n_inst, batch, input_dim) f32 -> (n_inst, batch, output_dim) f32."""
    n_inst, batch, input_dim = x.shape
    output_dim = head.shape[1]

    # Pack IPB instances per grid step onto the 128-wide lane axis.
    ipb = max(1, 128 // batch)
    n_groups = pl.cdiv(n_inst, ipb)
    n_pad = n_groups * ipb - n_inst
    if n_pad:
        x = jnp.concatenate(
            [x, jnp.zeros((n_pad, batch, input_dim), x.dtype)], axis=0)
    L = ipb * batch

    # (n_groups, L, input_dim) is a free reshape; one tiny transpose puts the
    # packed batch on lanes (fused into this jit -> no extra dispatch).
    x_t = jnp.transpose(x.reshape(n_groups, L, input_dim), (0, 2, 1))

    kernel = functools.partial(_nn_dos_kernel, layer_dims, output_dim, ipb, batch)
    out = pl.pallas_call(
        kernel,
        grid=(n_groups,),
        out_shape=jax.ShapeDtypeStruct((n_groups, output_dim, L), jnp.float32),
        in_specs=[
            pl.BlockSpec((None, input_dim, L), lambda i: (i, 0, 0)),
            pl.BlockSpec(w_stack.shape, lambda i: (0, 0, 0)),      # constant block
            pl.BlockSpec(gb_stack.shape, lambda i: (0, 0, 0, 0)),  # constant block
            pl.BlockSpec(head.shape, lambda i: (0, 0)),            # constant block
        ],
        out_specs=pl.BlockSpec((None, output_dim, L), lambda i: (i, 0, 0)),
        compiler_params=pltpu.CompilerParams(
            dimension_semantics=("parallel",)),   # megacore-shard groups (v7x)
    )(x_t, w_stack, gb_stack, head)

    if output_dim == 1:
        # (n_groups, 1, L) -> (n_inst, batch, 1): pure reshape, no transpose.
        y = out.reshape(n_groups * ipb, batch, 1)
    else:
        y = out.reshape(n_groups, output_dim, ipb, batch)
        y = jnp.transpose(y, (0, 2, 3, 1)).reshape(n_groups * ipb, batch, output_dim)
    return y[:n_inst]


def pack_nn_dos_params(params, input_dim):
    """Coalesce per-layer params into three dense kernel buffers (done once).

    Returns (w_stack, gb_stack, head, layer_dims).  The pre-BN Linear biases
    are intentionally NOT packed: bias + training-mode BatchNorm is an exact
    algebraic no-op (the reference keeps them, faithful to PyTorch).
    """
    hidden, (w_out, b_out) = params
    fan_outs = [w.shape[0] for (w, _, _, _) in hidden]
    fan_ins = [input_dim] + fan_outs[:-1]
    n_hidden = len(hidden)
    H = max(fan_outs)
    K = max(fan_ins)
    w_stack = jnp.zeros((n_hidden, H, K), jnp.float32)
    gb_stack = jnp.zeros((2, n_hidden, H, 1), jnp.float32)
    for li, (w, _b, g, be) in enumerate(hidden):
        fo, fi = w.shape
        w_stack = w_stack.at[li, :fo, :fi].set(w)
        gb_stack = gb_stack.at[0, li, :fo, :].set(g)
        gb_stack = gb_stack.at[1, li, :fo, :].set(be)
    head = jnp.concatenate([jnp.transpose(w_out), jnp.transpose(b_out)], axis=0)
    layer_dims = tuple((int(fi), int(fo)) for fi, fo in zip(fan_ins, fan_outs))
    return w_stack, gb_stack, head, layer_dims


def init_nn_dos_params(key, input_dim, output_dim, list_weights):
    """PyTorch-style init.  Hidden: [(W(out,in), b(out,1), gamma, beta)], head: (W, b)."""
    dims = [input_dim] + list(list_weights)
    hidden = []
    for i in range(len(list_weights)):
        fan_in, fan_out = dims[i], dims[i + 1]
        key, kw, kb = jax.random.split(key, 3)
        bound = 1.0 / (fan_in ** 0.5)
        w = jax.random.uniform(kw, (fan_out, fan_in), jnp.float32, -bound, bound)
        b = jax.random.uniform(kb, (fan_out, 1), jnp.float32, -bound, bound)
        g = jnp.ones((fan_out, 1), jnp.float32)
        be = jnp.zeros((fan_out, 1), jnp.float32)
        hidden.append((w, b, g, be))
    fan_in = list_weights[-1]
    key, kw, kb = jax.random.split(key, 3)
    bound = 1.0 / (fan_in ** 0.5)
    w_out = jax.random.uniform(kw, (output_dim, fan_in), jnp.float32, -bound, bound)
    b_out = jax.random.uniform(kb, (output_dim, 1), jnp.float32, -bound, bound)
    return hidden, (w_out, b_out)


def nn_dos_reference(x, params):
    """Pure-JAX faithful reference (pre-BN bias included, two-pass BN stats)."""
    hidden, (w_out, b_out) = params

    def single(xi):                                  # xi: (batch, input_dim)
        h = xi
        for (w, b, g, be) in hidden:
            z = jnp.dot(h, w.T, precision=jax.lax.Precision.HIGHEST) + b[:, 0]
            mean = jnp.mean(z, axis=0, keepdims=True)
            var = jnp.mean(jnp.square(z - mean), axis=0, keepdims=True)
            h = g[:, 0] * (z - mean) / jnp.sqrt(var + BN_EPS) + be[:, 0]
            h = jnp.maximum(h, 0.0)
        logits = jnp.dot(h, w_out.T, precision=jax.lax.Precision.HIGHEST) + b_out[:, 0]
        return jax.nn.sigmoid(logits)

    return jax.vmap(single)(x)


if __name__ == "__main__":
    # NN_DOS(input_dim=4, output_dim=1, activation_function=nn.ReLU(),
    #        list_weights=[32, 32]); 20 independent instances of batch 8
    # (16 instances pack one 128-lane grid step -> 2 grid steps, with padding).
    input_dim, output_dim = 4, 1
    list_weights = [32, 32]
    batch = 8
    n_instances = 20

    key = jax.random.PRNGKey(0)
    key, kx = jax.random.split(key)
    x = jax.random.normal(kx, (n_instances, batch, input_dim), dtype=jnp.float32)
    params = init_nn_dos_params(key, input_dim, output_dim, list_weights)
    w_stack, gb_stack, head, layer_dims = pack_nn_dos_params(params, input_dim)

    out = nn_dos_forward(x, w_stack, gb_stack, head, layer_dims=layer_dims)
    out = jax.block_until_ready(out)

    ref = nn_dos_reference(x, params)
    assert out.shape == (n_instances, batch, output_dim)
    assert jnp.allclose(out, ref, atol=5e-5, rtol=1e-4), "mismatch vs reference"

    print("KERNEL_OK")
</pallas_src>

<mosaic_0001>
module attributes {stable_mosaic.version = 11 : i64} {
  func.func @_nn_dos_kernel(%arg0: i32, %arg1: memref<1x4x128xf32, #tpu.memory_space<vmem>>, %arg2: memref<2x32x32xf32, #tpu.memory_space<vmem>>, %arg3: memref<2x2x32x1xf32, #tpu.memory_space<vmem>>, %arg4: memref<33x1xf32, #tpu.memory_space<vmem>>, %arg5: memref<1x1x128xf32, #tpu.memory_space<vmem>>) attributes {dimension_semantics = [#tpu.dimension_semantics<parallel>], iteration_bounds = array<i64: 2>, scalar_prefetch = 0 : i64, scratch_operands = 0 : i64, tpu.core_type = #tpu.core_type<tc>, window_params = [{transform_indices = @transform_0, window_bounds = array<i64: 1, 4, 128>}, {pipeline_mode = #tpu.pipeline_mode<synchronous>, transform_indices = @transform_1, window_bounds = array<i64: 2, 32, 32>}, {pipeline_mode = #tpu.pipeline_mode<synchronous>, transform_indices = @transform_2, window_bounds = array<i64: 2, 2, 32, 1>}, {pipeline_mode = #tpu.pipeline_mode<synchronous>, transform_indices = @transform_3, window_bounds = array<i64: 33, 1>}, {transform_indices = @transform_4, window_bounds = array<i64: 1, 1, 128>}]} {
    %0 = tpu.iota {dimensions = array<i32: 0>} : vector<128x16xi32>
    %1 = tpu.iota {dimensions = array<i32: 1>} : vector<128x16xi32>
    %c8_i32 = arith.constant 8 : i32
    %2 = vector.broadcast %c8_i32 : i32 to vector<128x16xi32>
    %3 = arith.muli %1, %2 : vector<128x16xi32>
    %4 = arith.cmpi sge, %0, %3 : vector<128x16xi32>
    %c1_i32 = arith.constant 1 : i32
    %5 = vector.broadcast %c1_i32 : i32 to vector<128x16xi32>
    %6 = arith.addi %1, %5 : vector<128x16xi32>
    %c8_i32_0 = arith.constant 8 : i32
    %7 = vector.broadcast %c8_i32_0 : i32 to vector<128x16xi32>
    %8 = arith.muli %6, %7 : vector<128x16xi32>
    %9 = arith.cmpi slt, %0, %8 : vector<128x16xi32>
    %10 = arith.andi %4, %9 : vector<128x16xi1>
    %cst = arith.constant 1.000000e+00 : f32
    %cst_1 = arith.constant 0.000000e+00 : f32
    %11 = vector.broadcast %cst : f32 to vector<128x16xf32>
    %12 = vector.broadcast %cst_1 : f32 to vector<128x16xf32>
    %13 = arith.select %10, %11, %12 : vector<128x16xi1>, vector<128x16xf32>
    %14 = tpu.iota {dimensions = array<i32: 0>} : vector<16x128xi32>
    %15 = tpu.iota {dimensions = array<i32: 1>} : vector<16x128xi32>
    %c8_i32_2 = arith.constant 8 : i32
    %16 = vector.broadcast %c8_i32_2 : i32 to vector<16x128xi32>
    %17 = arith.muli %14, %16 : vector<16x128xi32>
    %18 = arith.cmpi sge, %15, %17 : vector<16x128xi32>
    %c1_i32_3 = arith.constant 1 : i32
    %19 = vector.broadcast %c1_i32_3 : i32 to vector<16x128xi32>
    %20 = arith.addi %14, %19 : vector<16x128xi32>
    %c8_i32_4 = arith.constant 8 : i32
    %21 = vector.broadcast %c8_i32_4 : i32 to vector<16x128xi32>
    %22 = arith.muli %20, %21 : vector<16x128xi32>
    %23 = arith.cmpi slt, %15, %22 : vector<16x128xi32>
    %24 = arith.andi %18, %23 : vector<16x128xi1>
    %cst_5 = arith.constant 1.000000e+00 : f32
    %cst_6 = arith.constant 0.000000e+00 : f32
    %25 = vector.broadcast %cst_5 : f32 to vector<16x128xf32>
    %26 = vector.broadcast %cst_6 : f32 to vector<16x128xf32>
    %27 = arith.select %24, %25, %26 : vector<16x128xi1>, vector<16x128xf32>
    %c0 = arith.constant 0 : index
    %c0_7 = arith.constant 0 : index
    %c0_8 = arith.constant 0 : index
    %28 = vector.load %arg1[%c0, %c0_7, %c0_8] : memref<1x4x128xf32, #tpu.memory_space<vmem>>, vector<1x4x128xf32>
    %29 = vector.shape_cast %28 : vector<1x4x128xf32> to vector<4x128xf32>
    %c0_9 = arith.constant 0 : index
    %c0_10 = arith.constant 0 : index
    %c0_11 = arith.constant 0 : index
    %30 = vector.load %arg2[%c0_9, %c0_10, %c0_11] : memref<2x32x32xf32, #tpu.memory_space<vmem>>, vector<1x32x32xf32>
    %31 = vector.shape_cast %30 : vector<1x32x32xf32> to vector<32x32xf32>
    %32 = vector.extract_strided_slice %31 {offsets = [0, 0], sizes = [32, 4], strides = [1, 1]} : vector<32x32xf32> to vector<32x4xf32>
    %c0_12 = arith.constant 0 : index
    %c0_13 = arith.constant 0 : index
    %c0_14 = arith.constant 0 : index
    %c0_15 = arith.constant 0 : index
    %33 = vector.load %arg3[%c0_12, %c0_13, %c0_14, %c0_15] : memref<2x2x32x1xf32, #tpu.memory_space<vmem>>, vector<1x1x32x1xf32>
    %34 = vector.shape_cast %33 : vector<1x1x32x1xf32> to vector<32x1xf32>
    %c1 = arith.constant 1 : index
    %c0_16 = arith.constant 0 : index
    %c0_17 = arith.constant 0 : index
    %c0_18 = arith.constant 0 : index
    %35 = vector.load %arg3[%c1, %c0_16, %c0_17, %c0_18] : memref<2x2x32x1xf32, #tpu.memory_space<vmem>>, vector<1x1x32x1xf32>
    %36 = vector.shape_cast %35 : vector<1x1x32x1xf32> to vector<32x1xf32>
    %cst_19 = arith.constant dense<0.000000e+00> : vector<32x128xf32>
    %37 = tpu.matmul %32, %29, %cst_19 {dimension_numbers = #tpu.dot_dimension_numbers<[1], [0], [0], [1], [0, 0, 1, 1], [], []>} : vector<32x4xf32>, vector<4x128xf32>, vector<32x128xf32> -> vector<32x128xf32>
    %cst_20 = arith.constant dense<0.000000e+00> : vector<32x16xf32>
    %38 = tpu.matmul %37, %13, %cst_20 {dimension_numbers = #tpu.dot_dimension_numbers<[1], [0], [0], [1], [0, 0, 1, 1], [], []>} : vector<32x128xf32>, vector<128x16xf32>, vector<32x16xf32> -> vector<32x16xf32>
    %39 = arith.mulf %37, %37 : vector<32x128xf32>
    %cst_21 = arith.constant dense<0.000000e+00> : vector<32x16xf32>
    %40 = tpu.matmul %39, %13, %cst_21 {dimension_numbers = #tpu.dot_dimension_numbers<[1], [0], [0], [1], [0, 0, 1, 1], [], []>} : vector<32x128xf32>, vector<128x16xf32>, vector<32x16xf32> -> vector<32x16xf32>
    %cst_22 = arith.constant 1.250000e-01 : f32
    %41 = vector.broadcast %cst_22 : f32 to vector<32x16xf32>
    %42 = arith.mulf %38, %41 : vector<32x16xf32>
    %cst_23 = arith.constant 1.250000e-01 : f32
    %43 = vector.broadcast %cst_23 : f32 to vector<32x16xf32>
    %44 = arith.mulf %40, %43 : vector<32x16xf32>
    %45 = arith.mulf %42, %42 : vector<32x16xf32>
    %46 = arith.subf %44, %45 : vector<32x16xf32>
    %cst_24 = arith.constant 9.99999974E-6 : f32
    %47 = vector.broadcast %cst_24 : f32 to vector<32x16xf32>
    %48 = arith.addf %46, %47 : vector<32x16xf32>
    %49 = math.rsqrt %48 : vector<32x16xf32>
    %50 = vector.broadcast %34 : vector<32x1xf32> to vector<32x16xf32>
    %51 = arith.mulf %50, %49 : vector<32x16xf32>
    %52 = arith.mulf %42, %51 : vector<32x16xf32>
    %53 = vector.broadcast %36 : vector<32x1xf32> to vector<32x16xf32>
    %54 = arith.subf %53, %52 : vector<32x16xf32>
    %cst_25 = arith.constant dense<0.000000e+00> : vector<32x128xf32>
    %55 = tpu.matmul %51, %27, %cst_25 {dimension_numbers = #tpu.dot_dimension_numbers<[1], [0], [0], [1], [0, 0, 1, 1], [], []>} : vector<32x16xf32>, vector<16x128xf32>, vector<32x128xf32> -> vector<32x128xf32>
    %cst_26 = arith.constant dense<0.000000e+00> : vector<32x128xf32>
    %56 = tpu.matmul %54, %27, %cst_26 {dimension_numbers = #tpu.dot_dimension_numbers<[1], [0], [0], [1], [0, 0, 1, 1], [], []>} : vector<32x16xf32>, vector<16x128xf32>, vector<32x128xf32> -> vector<32x128xf32>
    %57 = arith.mulf %37, %55 : vector<32x128xf32>
    %58 = arith.addf %57, %56 : vector<32x128xf32>
    %cst_27 = arith.constant 0.000000e+00 : f32
    %59 = vector.broadcast %cst_27 : f32 to vector<32x128xf32>
    %60 = arith.maximumf %58, %59 : vector<32x128xf32>
    %c1_28 = arith.constant 1 : index
    %c0_29 = arith.constant 0 : index
    %c0_30 = arith.constant 0 : index
    %61 = vector.load %arg2[%c1_28, %c0_29, %c0_30] : memref<2x32x32xf32, #tpu.memory_space<vmem>>, vector<1x32x32xf32>
    %62 = vector.shape_cast %61 : vector<1x32x32xf32> to vector<32x32xf32>
    %c0_31 = arith.constant 0 : index
    %c1_32 = arith.constant 1 : index
    %c0_33 = arith.constant 0 : index
    %c0_34 = arith.constant 0 : index
    %63 = vector.load %arg3[%c0_31, %c1_32, %c0_33, %c0_34] : memref<2x2x32x1xf32, #tpu.memory_space<vmem>>, vector<1x1x32x1xf32>
    %64 = vector.shape_cast %63 : vector<1x1x32x1xf32> to vector<32x1xf32>
    %c1_35 = arith.constant 1 : index
    %c1_36 = arith.constant 1 : index
    %c0_37 = arith.constant 0 : index
    %c0_38 = arith.constant 0 : index
    %65 = vector.load %arg3[%c1_35, %c1_36, %c0_37, %c0_38] : memref<2x2x32x1xf32, #tpu.memory_space<vmem>>, vector<1x1x32x1xf32>
    %66 = vector.shape_cast %65 : vector<1x1x32x1xf32> to vector<32x1xf32>
    %cst_39 = arith.constant dense<0.000000e+00> : vector<32x128xf32>
    %67 = tpu.matmul %62, %60, %cst_39 {dimension_numbers = #tpu.dot_dimension_numbers<[1], [0], [0], [1], [0, 0, 1, 1], [], []>} : vector<32x32xf32>, vector<32x128xf32>, vector<32x128xf32> -> vector<32x128xf32>
    %cst_40 = arith.constant dense<0.000000e+00> : vector<32x16xf32>
    %68 = tpu.matmul %67, %13, %cst_40 {dimension_numbers = #tpu.dot_dimension_numbers<[1], [0], [0], [1], [0, 0, 1, 1], [], []>} : vector<32x128xf32>, vector<128x16xf32>, vector<32x16xf32> -> vector<32x16xf32>
    %69 = arith.mulf %67, %67 : vector<32x128xf32>
    %cst_41 = arith.constant dense<0.000000e+00> : vector<32x16xf32>
    %70 = tpu.matmul %69, %13, %cst_41 {dimension_numbers = #tpu.dot_dimension_numbers<[1], [0], [0], [1], [0, 0, 1, 1], [], []>} : vector<32x128xf32>, vector<128x16xf32>, vector<32x16xf32> -> vector<32x16xf32>
    %cst_42 = arith.constant 1.250000e-01 : f32
    %71 = vector.broadcast %cst_42 : f32 to vector<32x16xf32>
    %72 = arith.mulf %68, %71 : vector<32x16xf32>
    %cst_43 = arith.constant 1.250000e-01 : f32
    %73 = vector.broadcast %cst_43 : f32 to vector<32x16xf32>
    %74 = arith.mulf %70, %73 : vector<32x16xf32>
    %75 = arith.mulf %72, %72 : vector<32x16xf32>
    %76 = arith.subf %74, %75 : vector<32x16xf32>
    %cst_44 = arith.constant 9.99999974E-6 : f32
    %77 = vector.broadcast %cst_44 : f32 to vector<32x16xf32>
    %78 = arith.addf %76, %77 : vector<32x16xf32>
    %79 = math.rsqrt %78 : vector<32x16xf32>
    %80 = vector.broadcast %64 : vector<32x1xf32> to vector<32x16xf32>
    %81 = arith.mulf %80, %79 : vector<32x16xf32>
    %82 = arith.mulf %72, %81 : vector<32x16xf32>
    %83 = vector.broadcast %66 : vector<32x1xf32> to vector<32x16xf32>
    %84 = arith.subf %83, %82 : vector<32x16xf32>
    %cst_45 = arith.constant dense<0.000000e+00> : vector<32x128xf32>
    %85 = tpu.matmul %81, %27, %cst_45 {dimension_numbers = #tpu.dot_dimension_numbers<[1], [0], [0], [1], [0, 0, 1, 1], [], []>} : vector<32x16xf32>, vector<16x128xf32>, vector<32x128xf32> -> vector<32x128xf32>
    %cst_46 = arith.constant dense<0.000000e+00> : vector<32x128xf32>
    %86 = tpu.matmul %84, %27, %cst_46 {dimension_numbers = #tpu.dot_dimension_numbers<[1], [0], [0], [1], [0, 0, 1, 1], [], []>} : vector<32x16xf32>, vector<16x128xf32>, vector<32x128xf32> -> vector<32x128xf32>
    %87 = arith.mulf %67, %85 : vector<32x128xf32>
    %88 = arith.addf %87, %86 : vector<32x128xf32>
    %cst_47 = arith.constant 0.000000e+00 : f32
    %89 = vector.broadcast %cst_47 : f32 to vector<32x128xf32>
    %90 = arith.maximumf %88, %89 : vector<32x128xf32>
    %c0_48 = arith.constant 0 : index
    %c0_49 = arith.constant 0 : index
    %91 = vector.load %arg4[%c0_48, %c0_49] : memref<33x1xf32, #tpu.memory_space<vmem>>, vector<32x1xf32>
    %c32 = arith.constant 32 : index
    %c0_50 = arith.constant 0 : index
    %92 = vector.load %arg4[%c32, %c0_50] : memref<33x1xf32, #tpu.memory_space<vmem>>, vector<1x1xf32>
    %93 = vector.broadcast %91 : vector<32x1xf32> to vector<32x128xf32>
    %94 = arith.mulf %93, %90 : vector<32x128xf32>
    %cst_51 = arith.constant dense<0.000000e+00> : vector<128xf32>
    %95 = vector.multi_reduction <add>, %94, %cst_51 [0] : vector<32x128xf32> to vector<128xf32>
    %96 = vector.shape_cast %95 : vector<128xf32> to vector<1x128xf32>
    %97 = vector.broadcast %92 : vector<1x1xf32> to vector<1x128xf32>
    %98 = arith.addf %96, %97 : vector<1x128xf32>
    %99 = math.absf %98 : vector<1x128xf32>
    %cst_52 = arith.constant 0.000000e+00 : f32
    %100 = vector.broadcast %cst_52 : f32 to vector<1x128xf32>
    %101 = arith.subf %100, %99 : vector<1x128xf32>
    %102 = math.exp %101 : vector<1x128xf32>
    %cst_53 = arith.constant 1.000000e+00 : f32
    %103 = vector.broadcast %cst_53 : f32 to vector<1x128xf32>
    %104 = arith.addf %103, %102 : vector<1x128xf32>
    %105 = tpu.reciprocal %104 : vector<1x128xf32> -> vector<1x128xf32>
    %cst_54 = arith.constant 0.000000e+00 : f32
    %106 = vector.broadcast %cst_54 : f32 to vector<1x128xf32>
    %107 = arith.cmpf oge, %98, %106 : vector<1x128xf32>
    %108 = arith.mulf %102, %105 : vector<1x128xf32>
    %109 = arith.select %107, %105, %108 : vector<1x128xi1>, vector<1x128xf32>
    %c0_55 = arith.constant 0 : index
    %c0_56 = arith.constant 0 : index
    %c0_57 = arith.constant 0 : index
    %110 = vector.load %arg5[%c0_55, %c0_56, %c0_57] : memref<1x1x128xf32, #tpu.memory_space<vmem>>, vector<1x1x128xf32>
    %111 = vector.shape_cast %110 : vector<1x1x128xf32> to vector<1x128xf32>
    %112 = vector.shape_cast %109 : vector<1x128xf32> to vector<1x1x128xf32>
    tpu.vector_store %arg5[%c0_55, %c0_56, %c0_57], %112 {strides = array<i32>} : memref<1x1x128xf32, #tpu.memory_space<vmem>>, vector<1x1x128xf32>,
    return
  }
  func.func @transform_0(%arg0: i32) -> (i32, i32, i32) {
    %c0_i32 = arith.constant 0 : i32
    %c0_i32_0 = arith.constant 0 : i32
    %c0_i32_1 = arith.constant 0 : i32
    return %arg0, %c0_i32, %c0_i32_0 : i32, i32, i32
  }
  func.func @transform_1(%arg0: i32) -> (i32, i32, i32) {
    %c0_i32 = arith.constant 0 : i32
    %c0_i32_0 = arith.constant 0 : i32
    %c0_i32_1 = arith.constant 0 : i32
    %c0_i32_2 = arith.constant 0 : i32
    return %c0_i32, %c0_i32_0, %c0_i32_1 : i32, i32, i32
  }
  func.func @transform_2(%arg0: i32) -> (i32, i32, i32, i32) {
    %c0_i32 = arith.constant 0 : i32
    %c0_i32_0 = arith.constant 0 : i32
    %c0_i32_1 = arith.constant 0 : i32
    %c0_i32_2 = arith.constant 0 : i32
    %c0_i32_3 = arith.constant 0 : i32
    return %c0_i32, %c0_i32_0, %c0_i32_1, %c0_i32_2 : i32, i32, i32, i32
  }
  func.func @transform_3(%arg0: i32) -> (i32, i32) {
    %c0_i32 = arith.constant 0 : i32
    %c0_i32_0 = arith.constant 0 : i32
    %c0_i32_1 = arith.constant 0 : i32
    return %c0_i32, %c0_i32_0 : i32, i32
  }
  func.func @transform_4(%arg0: i32) -> (i32, i32, i32) {
    %c0_i32 = arith.constant 0 : i32
    %c0_i32_0 = arith.constant 0 : i32
    %c0_i32_1 = arith.constant 0 : i32
    return %arg0, %c0_i32, %c0_i32_0 : i32, i32, i32
  }
}

</mosaic_0001>

<bundles_post_ra>
// kernel: nn_dos_forward.1
= control target key start
LH: loop header
LB: loop body
LE: loop exit
PB: predicated region body
PF: predicated region fallthrough
CT: control target
= control target key end

     0   :  { %s2207_s15 = smov 0   ;;  %s2716_s0 = inlined_call_operand.vmem [shape: f32[2,4,128], index: 0, kind: input, shape index: {}]   ;;  %s2717_s1 = inlined_call_operand.vmem [shape: f32[2,32,32], index: 1, kind: input, shape index: {}]   ;;  %s2718_s2 = inlined_call_operand.vmem [shape: f32[2,2,32,1], index: 2, kind: input, shape index: {}]   ;;  %s2719_s3 = inlined_call_operand.vmem [shape: f32[33,1], index: 3, kind: input, shape index: {}]   ;;  %s2720_s4 = inlined_call_operand.vmem [shape: f32[2,1,128], index: 4, kind: output, shape index: {}]  }
   0x1 LB: > { %s1534_s16 = sadd.s32 4294967295, %s2178_s15   ;;  %p1538_p0 = scmp.ge.s32.totalorder %s2178_s15, 1  ;;  %s2178_s15 = sphi %s2207_s15, %s14_s15  }
   0x2   : > { %p161_p1 = scmp.lt.s32.totalorder %s2178_s15, 3 }
   0x4   : > { %p162_p2 = pnand %p1538_p0, %p161_p1 }
   0x5   : > { %p184_p3 = scmp.lt.s32.totalorder (!%p162_p2), %s1534_s16, 1  ;;  %v292_v0 = vld [vmem:[%s2717_s1] sm:$0xff] (!%p162_p2)  ;;  %vm305_vm0 = vcmask (!%p162_p2), 31744   ;;  %v191_v1 = vlaneseq (!%p162_p2)  ;;  %vm318_vm1 = vcmask (!%p162_p2), 1043456   ;;  %v293_v9 = vld [vmem:[%s2717_s1 + $0x8] sm:$0xff] (!%p162_p2)  ;;  %v294_v12 = vld [vmem:[%s2717_s1 + $0x10] sm:$0xff] (!%p162_p2) }
   0x6   : > { %165 = sbr.rel (%p162_p2) target bundleno = 1429 (0x595), region = 36  ;;  %1774 = vmatprep.mubr.msk.f32.mxu0 (!%p162_p2), %vm305_vm0, %v292_v0  ;;  %v295_v15 = vld [vmem:[%s2717_s1 + $0x18] sm:$0xff] (!%p162_p2)  ;;  %v2180_v18 = vmov (!%p162_p2), 1.0|1.0   ;;  %v2727_v23 = vmov (!%p162_p2), 0  ;;  %v296_v35 = vld [vmem:[%s2718_s2] sm:$0xff] (!%p162_p2) }
   0x7   : > { %v2221_v2 = vshrl.u32 (!%p162_p2), %v191_v1, 7  ;;  %v2223_v3 = vand.u32 (!%p162_p2), 127, %v191_v1  ;;  %v298_v36 = vld [vmem:[%s2718_s2 + $0x10] sm:$0xff] (!%p162_p2)  ;;  %v2181_v37 = vmov (!%p162_p2), 0   ;;  %v297_v38 = vld [vmem:[%s2718_s2 + $0x8] sm:$0xff] (!%p162_p2)  ;;  %v1540_v39 = vld [vmem:[%s2718_s2 + $0x40] sm:$0xff] (!%p162_p2) }
   0x8   : > { %2150 = vset.pattern.permute.xlu0 (!%p162_p2), %v2181_v37  ;;  %2151 = vset.pattern.permute.xlu1 (!%p162_p2), %v2181_v37  ;;  %v299_v40 = vld [vmem:[%s2718_s2 + $0x18] sm:$0xff] (!%p162_p2)  ;;  %v1541_v41 = vld [vmem:[%s2718_s2 + $0x48] sm:$0xff] (!%p162_p2)  ;;  %v1542_v42 = vld [vmem:[%s2718_s2 + $0x50] sm:$0xff] (!%p162_p2) }
   0x9   : > { %v2227_v4 = vadd.s32 (!%p162_p2), 8, %v2221_v2  ;;  %v2230_v5 = vmul.u32 (!%p162_p2), 8, %v2223_v3  ;;  %v227_v6 = vadd.s32 (!%p162_p2), 1, %v2223_v3  ;;  %v194_v7 = vadd.s32 (!%p162_p2), 16, %v2221_v2  ;;  %607 = vperm.xlu0 (!%p162_p2), %2150, %v296_v35   ;;  %617 = vperm.xlu1 (!%p162_p2), %2151, %v298_v36   ;;  %v1543_v43 = vld [vmem:[%s2718_s2 + $0x58] sm:$0xff] (!%p162_p2)  ;;  %v1597_v44 = vld [vmem:[%s2718_s2 + $0x20] sm:$0xff] (!%p162_p2) }
   0xa   : > { %v195_v11 = vadd.s32 (!%p162_p2), 24, %v2221_v2  ;;  %v196_v13 = vadd.s32 (!%p162_p2), 32, %v2221_v2  ;;  %v197_v14 = vadd.s32 (!%p162_p2), 40, %v2221_v2  ;;  %v198_v17 = vadd.s32 (!%p162_p2), 48, %v2221_v2  ;;  %v1598_v45 = vld [vmem:[%s2718_s2 + $0x28] sm:$0xff] (!%p162_p2)  ;;  %v1599_v46 = vld [vmem:[%s2718_s2 + $0x30] sm:$0xff] (!%p162_p2) }
   0xb   : > { %vm211_vm2 = vcmp.ge.s32.totalorder (!%p162_p2), %v2221_v2, %v2230_v5  ;;  %v2242_v10 = vmul.u32 (!%p162_p2), 8, %v227_v6  ;;  %vm212_vm3 = vcmp.ge.s32.totalorder (!%p162_p2), %v2227_v4, %v2230_v5  ;;  %vm213_vm7 = vcmp.ge.s32.totalorder (!%p162_p2), %v194_v7, %v2230_v5  ;;  %v1600_v47 = vld [vmem:[%s2718_s2 + $0x38] sm:$0xff] (!%p162_p2)  ;;  %v1601_v48 = vld [vmem:[%s2718_s2 + $0x60] sm:$0xff] (!%p162_p2)  ;;  %v1602_v49 = vld [vmem:[%s2718_s2 + $0x68] sm:$0xff] (!%p162_p2) }
   0xc   : > { %vm214_vm10 = vcmp.ge.s32.totalorder (!%p162_p2), %v195_v11, %v2230_v5  ;;  %vm215_vm14 = vcmp.ge.s32.totalorder (!%p162_p2), %v196_v13, %v2230_v5  ;;  %v199_v19 = vadd.s32 (!%p162_p2), 56, %v2221_v2  ;;  %v200_v21 = vadd.s32 (!%p162_p2), 64, %v2221_v2  ;;  %v1603_v50 = vld [vmem:[%s2718_s2 + $0x70] sm:$0xff] (!%p162_p2)  ;;  %v1604_v51 = vld [vmem:[%s2718_s2 + $0x78] sm:$0xff] (!%p162_p2)  ;;  %v1433_v52 = vld [vmem:[%s2719_s3] sm:$0xff] (!%p162_p2) }
   0xd   : > { %s2743_s16 = smov (!%p184_p3, %s1534_s16), 1  ;;  %vm229_vm4 = vcmp.lt.s32.totalorder %v2221_v2, %v2242_v10  ;;  %vm230_vm5 = vcmp.lt.s32.totalorder %v2227_v4, %v2242_v10  ;;  %vm231_vm8 = vcmp.lt.s32.totalorder %v194_v7, %v2242_v10  ;;  %vm232_vm11 = vcmp.lt.s32.totalorder %v195_v11, %v2242_v10  ;;  %612 = vperm.xlu0 %2150, %v297_v38   ;;  %v1434_v53 = vld [vmem:[%s2719_s3 + $0x8] sm:$0xff]  ;;  %v1435_v54 = vld [vmem:[%s2719_s3 + $0x10] sm:$0xff]  ;;  %v1436_v55 = vld [vmem:[%s2719_s3 + $0x18] sm:$0xff] }
   0xe   : > { %s1539_s19 = sshll.u32 %s2743_s16, 2  ;;  %vm245_vm6 = vmand %vm211_vm2, %vm229_vm4  ;;  %vm233_vm15 = vcmp.lt.s32.totalorder %v196_v13, %v2242_v10  ;;  %vm216_vm2 = vcmp.ge.s32.totalorder %v197_v14, %v2230_v5  ;;  %v201_v22 = vadd.s32 72, %v2221_v2  ;;  %v202_v24 = vadd.s32 80, %v2221_v2  ;;  %635 = vperm.xlu1 %2151, %v1540_v39   ;;  %v1437_v56 = vld [vmem:[%s2719_s3 + $0x20] sm:$0x1]  ;;  %s190_s7 = scalar_lea.vmem %s2720_s4, %s2743_s16 }
   0xf   : > { %s187_s22 = scalar_lea.vmem %s2716_s0, %s1539_s19  ;;  %vm246_vm9 = vmand %vm212_vm3, %vm230_vm5  ;;  %vm234_vm3 = vcmp.lt.s32.totalorder %v197_v14, %v2242_v10  ;;  %vm217_vm5 = vcmp.ge.s32.totalorder %v198_v17, %v2230_v5  ;;  %v203_v25 = vadd.s32 88, %v2221_v2  ;;  %v204_v27 = vadd.s32 96, %v2221_v2 }
  0x10   : > { %v291_v8 = vld [vmem:[%s187_s22] sm:$0xf]  ;;  %vm2265_vm12 = vmpackc.low %vm246_vm9, %vm245_vm6  ;;  %vm235_vm6 = vcmp.lt.s32.totalorder %v198_v17, %v2242_v10  ;;  %vm236_vm9 = vcmp.lt.s32.totalorder %v199_v19, %v2242_v10  ;;  %v205_v28 = vadd.s32 104, %v2221_v2  ;;  %v206_v30 = vadd.s32 112, %v2221_v2 }
  0x11   : > { %1772 = vmatprep.subr.msk.mxu0 %vm318_vm1, %v291_v8  ;;  %1987 = vmatprep.subr.msk.bf16.mxu1 %vm2265_vm12, %v2180_v18  ;;  %vm247_vm13 = vmand %vm213_vm7, %vm231_vm8  ;;  %vm218_vm8 = vcmp.ge.s32.totalorder %v199_v19, %v2230_v5  ;;  %v207_v31 = vadd.s32 120, %v2221_v2  ;;  %v281_v1 = vadd.s32 1, %v2221_v2  ;;  %v277_v6 = vmul.u32 8, %v2221_v2 }
  0x12   : > { %1773 = vmatpush3.msk.msra.mxu0 %vm318_vm1, %v291_v8  ;;  %1989 = vmatpush3.bf16.msk.msra.mxu1 %vm2265_vm12, %v2180_v18  ;;  %vm248_vm1 = vmand %vm214_vm10, %vm232_vm11  ;;  %v278_v7 = vmul.u32 8, %v2227_v4 }
  0x13   : > { %1775 = vmatmul.mubr.msk.f32.vlgmr.msra.gmra.mrb[0].mxu0 %vm305_vm0, %v293_v9  ;;  %2019 = vmatprep.subr.msk.bf16.mxu0 %vm2265_vm12, %v2180_v18  ;;  %vm2288_vm4 = vmpackc.low %vm248_vm1, %vm247_vm13  ;;  %vm219_vm13 = vcmp.ge.s32.totalorder %v200_v21, %v2230_v5  ;;  %vm220_vm1 = vcmp.ge.s32.totalorder %v201_v22, %v2230_v5  ;;  %v283_v8 = vmul.u32 8, %v281_v1 }
  0x14   : > { %1777 = vmatprep.mubr.msk.f32.mxu0 %vm305_vm0, %v294_v12  ;;  %2021 = vmatpush3.bf16.msk.msra.mxu0 %vm2265_vm12, %v2180_v18  ;;  %vm250_vm7 = vmand %vm216_vm2, %vm234_vm3  ;;  %vm238_vm2 = vcmp.lt.s32.totalorder %v201_v22, %v2242_v10 }
  0x15   : > { %1991 = vmatprep.subr.msk.bf16.mxu1 %vm2288_vm4, %v2180_v18  ;;  %2023 = vmatprep.subr.msk.bf16.mxu0 %vm2288_vm4, %v2180_v18  ;;  %vm251_vm11 = vmand %vm217_vm5, %vm235_vm6  ;;  %vm221_vm5 = vcmp.ge.s32.totalorder %v202_v24, %v2230_v5  ;;  %vm239_vm6 = vcmp.lt.s32.totalorder %v202_v24, %v2242_v10 }
  0x16   : > { %1993 = vmatpush3.bf16.msk.msra.mxu1 %vm2288_vm4, %v2180_v18  ;;  %622 = vperm.xlu0 %2150, %v299_v40  }
  0x17   : > { %1778 = vmatmul.mubr.msk.f32.gmra.mrb[2].mxu0 %vm305_vm0, %v295_v15  ;;  %vm249_vm0 = vmand %vm215_vm14, %vm233_vm15  ;;  %vm237_vm14 = vcmp.lt.s32.totalorder %v200_v21, %v2242_v10  ;;  %640 = vperm.xlu1 %2151, %v1541_v41  }
  0x18   : > { %vm2307_vm10 = vmpackc.low %vm250_vm7, %vm249_vm0  ;;  %2025 = vmatpush3.bf16.msk.msra.mxu0 %vm2288_vm4, %v2180_v18 }
  0x19   : > { %v2728_v23 = vsel %vm2307_vm10, 4294967295, %v2727_v23  ;;  %1995 = vmatprep.subr.msk.bf16.mxu1 %vm2307_vm10, %v2180_v18  ;;  %2027 = vmatprep.subr.msk.bf16.mxu0 %vm2307_vm10, %v2180_v18  ;;  %vm252_vm15 = vmand %vm218_vm8, %vm236_vm9  ;;  %vm222_vm8 = vcmp.ge.s32.totalorder %v203_v25, %v2230_v5  ;;  %vm240_vm9 = vcmp.lt.s32.totalorder %v203_v25, %v2242_v10 }
  0x1a   : > { %vm2326_vm3 = vmpackc.low %vm252_vm15, %vm251_vm11  ;;  %1997 = vmatpush3.bf16.msk.msra.mxu1 %vm2307_vm10, %v2180_v18  ;;  %vm241_vm15 = vcmp.lt.s32.totalorder %v204_v27, %v2242_v10  ;;  %645 = vperm.xlu0 %2150, %v1542_v42  }
  0x1b   : > { %vm253_vm0 = vmand %vm219_vm13, %vm237_vm14  ;;  %1999 = vmatprep.subr.msk.bf16.mxu1 %vm2326_vm3, %v2180_v18  ;;  %vm223_vm14 = vcmp.ge.s32.totalorder %v204_v27, %v2230_v5  ;;  %650 = vperm.xlu1 %2151, %v1543_v43  }
  0x1c   : > { %2029 = vmatpush3.bf16.msk.msra.mxu0 %vm2307_vm10, %v2180_v18  ;;  %vm254_vm7 = vmand %vm220_vm1, %vm238_vm2  ;;  %vm224_vm2 = vcmp.ge.s32.totalorder %v205_v28, %v2230_v5  ;;  %vm242_vm10 = vcmp.lt.s32.totalorder %v205_v28, %v2242_v10 }
  0x1d   : > { %2031 = vmatprep.subr.msk.bf16.mxu0 %vm2326_vm3, %v2180_v18  ;;  %vm2348_vm11 = vmpackc.low %vm254_vm7, %vm253_vm0  ;;  %vm225_vm7 = vcmp.ge.s32.totalorder %v206_v30, %v2230_v5 }
  0x1e   : > { %vm255_vm13 = vmand %vm221_vm5, %vm239_vm6  ;;  %2001 = vmatpush3.bf16.msk.msra.mxu1 %vm2326_vm3, %v2180_v18  ;;  %1177 = vperm.xlu0 %2150, %v1597_v44  }
  0x1f   : > { %vm256_vm1 = vmand %vm222_vm8, %vm240_vm9  ;;  %2003 = vmatprep.subr.msk.bf16.mxu1 %vm2348_vm11, %v2180_v18  ;;  %vm243_vm8 = vcmp.lt.s32.totalorder %v206_v30, %v2242_v10  ;;  %vm226_vm9 = vcmp.ge.s32.totalorder %v207_v31, %v2230_v5  ;;  %1182 = vperm.xlu1 %2151, %v1598_v45   ;;  %v282_v5 = vadd.s32 1, %v2227_v4 }
  0x20   : > { %2033 = vmatpush3.bf16.msk.msra.mxu0 %vm2326_vm3, %v2180_v18  ;;  %vm2367_vm0 = vmpackc.low %vm256_vm1, %vm255_vm13  ;;  %vm244_vm13 = vcmp.lt.s32.totalorder %v207_v31, %v2242_v10 }
  0x21   : > { %2035 = vmatprep.subr.msk.bf16.mxu0 %vm2348_vm11, %v2180_v18  ;;  %vm257_vm5 = vmand %vm223_vm14, %vm241_vm15  ;;  %v284_v9 = vmul.u32 8, %v282_v5 }
  0x22   : > { %vm258_vm6 = vmand %vm224_vm2, %vm242_vm10  ;;  %2005 = vmatpush3.bf16.msk.msra.mxu1 %vm2348_vm11, %v2180_v18  ;;  %1187 = vperm.xlu0 %2150, %v1599_v46   ;;  %vm279_vm2 = vcmp.ge.s32.totalorder %v2223_v3, %v277_v6 }
  0x23   : > { %2007 = vmatprep.subr.msk.bf16.mxu1 %vm2367_vm0, %v2180_v18  ;;  %vm2387_vm10 = vmpackc.low %vm258_vm6, %vm257_vm5  ;;  %1192 = vperm.xlu1 %2151, %v1600_v47   ;;  %vm280_vm5 = vcmp.ge.s32.totalorder %v2223_v3, %v278_v7  ;;  %vm285_vm6 = vcmp.lt.s32.totalorder %v2223_v3, %v283_v8 }
  0x24   : > { %2037 = vmatpush3.bf16.msk.msra.mxu0 %vm2348_vm11, %v2180_v18  ;;  %vm259_vm14 = vmand %vm225_vm7, %vm243_vm8  ;;  %vm286_vm7 = vcmp.lt.s32.totalorder %v2223_v3, %v284_v9 }
  0x25   : > { %2039 = vmatprep.subr.msk.bf16.mxu0 %vm2367_vm0, %v2180_v18  ;;  %vm260_vm15 = vmand %vm226_vm9, %vm244_vm13 }
  0x26   : > { %2009 = vmatpush3.bf16.msk.msra.mxu1 %vm2367_vm0, %v2180_v18  ;;  %vm2406_vm1 = vmpackc.low %vm260_vm15, %vm259_vm14  ;;  %1205 = vperm.xlu0 %2150, %v1601_v48   ;;  %vm657_vm14 = vcmask 130048   ;;  %vm2741_vm15 = vnez %v2728_v23 }
  0x27   : > { %2011 = vmatprep.subr.msk.bf16.mxu1 %vm2387_vm10, %v2180_v18  ;;  %1210 = vperm.xlu1 %2151, %v1602_v49   ;;  %vm287_vm8 = vmand %vm279_vm2, %vm285_vm6  ;;  %vm879_vm2 = vcmask 261120  }
  0x28   : > { %2041 = vmatpush3.bf16.msk.msra.mxu0 %vm2367_vm0, %v2180_v18  ;;  %vm288_vm9 = vmand %vm280_vm5, %vm286_vm7 }
  0x29   : > { %2043 = vmatprep.subr.msk.bf16.mxu0 %vm2387_vm10, %v2180_v18  ;;  %vm2519_vm13 = vmpackc.low %vm288_vm9, %vm287_vm8 }
  0x2a   : > { %2013 = vmatpush3.bf16.msk.msra.mxu1 %vm2387_vm10, %v2180_v18  ;;  %1215 = vperm.xlu0 %2150, %v1603_v50  }
  0x2b   : > { %2015 = vmatprep.subr.msk.bf16.mxu1 %vm2406_vm1, %v2180_v18  ;;  %1220 = vperm.xlu1 %2151, %v1604_v51  }
  0x2c   : > { %2045 = vmatpush3.bf16.msk.msra.mxu0 %vm2387_vm10, %v2180_v18 }
  0x2d   : > { %2047 = vmatprep.subr.msk.bf16.mxu0 %vm2406_vm1, %v2180_v18 }
  0x2e   : > { %2017 = vmatpush3.bf16.msk.msra.mxu1 %vm2406_vm1, %v2180_v18  ;;  %1440 = vperm.xlu0 %2150, %v1433_v52  }
  0x2f   : > { %1445 = vperm.xlu1 %2151, %v1434_v53   ;;  %2051 = vmatprep.subr.msk.bf16.mxu1 %vm2519_vm13, %v2180_v18 }
  0x30   : > { %2049 = vmatpush3.bf16.msk.msra.mxu0 %vm2406_vm1, %v2180_v18 }
  0x31   : > { %2055 = vmatprep.subr.msk.bf16.mxu0 %vm2519_vm13, %v2180_v18 }
  0x32   : > { %1450 = vperm.xlu0 %2150, %v1435_v54  }
  0x33   : > { %1455 = vperm.xlu1 %2151, %v1436_v55  }
  0x36   : > { %1473 = vperm.xlu0 %2150, %v1437_v56  }
  0x88   : > { %v608_v42 = vpop.permute.xlu0 %607  ;;  %v618_v44 = vpop.permute.xlu1 %617 }
  0x8c   : > { %v613_v47 = vpop.permute.xlu0 %612 }
  0x8d   : > { %v636_v48 = vpop.permute.xlu1 %635 }
  0x95   : > { %v623_v53 = vpop.permute.xlu0 %622 }
  0x96   : > { %v641_v56 = vpop.permute.xlu1 %640 }
  0x99   : > { %v646_v8 = vpop.permute.xlu0 %645 }
  0x9a   : > { %v651_v9 = vpop.permute.xlu1 %650 }
  0xe6   : > { %v2491_v57 = vpop.f32.mrb[0].mxu0 }
  0xe7   : > { %v2493_v58 = vpop.f32.mrb[1].mxu0  ;;  %v493_v60 = vmul.f32 %v2491_v57, %v2491_v57 }
  0xe8   : > { %v492_v59 = vmul.f32 %v2493_v58, %v2493_v58  ;;  %1812 = vmatprep.mubr.f32.mxu1 %v2493_v58 }
  0xe9   : > { %1813 = vmatmul.mubr.f32.vlgmr.msra.gmra.mrb[0].mxu1 %v2491_v57 }
  0xea   : > { %v2501_v61 = vpop.f32.mrb[2].mxu0  ;;  %1850 = vmatprep.mubr.f32.mxu0 %v492_v59  ;;  %2053 = vmatpush3.bf16.msk.msra.mxu1 %vm2519_vm13, %v2180_v18 }
  0xeb   : > { %v2503_v62 = vpop.f32.mrb[3].mxu0  ;;  %1851 = vmatmul.mubr.f32.vlgmr.msra.gmra.mrb[4].mxu0 %v493_v60  ;;  %v495_v0 = vmul.f32 %v2501_v61, %v2501_v61 }
  0xec   : > { %v494_v63 = vmul.f32 %v2503_v62, %v2503_v62  ;;  %1815 = vmatprep.mubr.f32.mxu1 %v2503_v62  ;;  %2057 = vmatpush3.bf16.msk.msra.mxu0 %vm2519_vm13, %v2180_v18 }
  0xed   : > { %1816 = vmatmul.mubr.f32.gmra.mrb[2].mxu1 %v2501_v61  ;;  %2067 = vmatprep.subr.msk.bf16.mxu0 %vm2265_vm12, %v2180_v18 }
  0xee   : > { %1853 = vmatprep.mubr.f32.mxu0 %v494_v63 }
  0xef   : > { %1854 = vmatmul.mubr.f32.gmra.mrb[6].mxu0 %v495_v0 }
 0x1bc   : > { %v1814_v2 = vpop.f32.mrb[0].mxu1 }
 0x1bd   : > { %v582_v3 = vmul.f32 0.125, %v1814_v2  ;;  %v473_v4 = vpop.f32.mrb[1].mxu1 }
 0x1be   : > { %v581_v11 = vmul.f32 0.125, %v473_v4  ;;  %v1852_v12 = vpop.f32.mrb[4].mxu0  ;;  %v1593_v4 = vld [vmem:[%s2717_s1 + $0x20] sm:$0xff] }
 0x1bf   : > { %v590_v13 = vmul.f32 %v582_v3, %v582_v3  ;;  %v586_v14 = vmul.f32 0.125, %v1852_v12  ;;  %v562_v15 = vpop.f32.mrb[5].mxu0 }
 0x1c0   : > { %v589_v17 = vmul.f32 %v581_v11, %v581_v11  ;;  %v585_v19 = vmul.f32 0.125, %v562_v15  ;;  %v1817_v21 = vpop.f32.mrb[2].mxu1 }
 0x1c1   : > { %v594_v22 = vsub.f32 %v586_v14, %v590_v13  ;;  %v584_v24 = vmul.f32 0.125, %v1817_v21  ;;  %v483_v25 = vpop.f32.mrb[3].mxu1 }
 0x1c2   : > { %v593_v27 = vsub.f32 %v585_v19, %v589_v17  ;;  %v583_v28 = vmul.f32 0.125, %v483_v25  ;;  %v1855_v30 = vpop.f32.mrb[6].mxu0 }
 0x1c3   : > { %v598_v31 = vadd.f32 1e-05, %v594_v22  ;;  %v592_v35 = vmul.f32 %v584_v24, %v584_v24  ;;  %v588_v36 = vmul.f32 0.125, %v1855_v30  ;;  %v572_v37 = vpop.f32.mrb[7].mxu0 }
 0x1c4   : > { %v597_v38 = vadd.f32 1e-05, %v593_v27  ;;  %v591_v39 = vmul.f32 %v583_v28, %v583_v28  ;;  %v587_v40 = vmul.f32 0.125, %v572_v37 }
 0x1c5   : > { %2152 = vrsqrt.f32 %v598_v31  ;;  %v596_v41 = vsub.f32 %v588_v36, %v592_v35 }
 0x1c6   : > { %2154 = vrsqrt.f32 %v597_v38  ;;  %v595_v43 = vsub.f32 %v587_v40, %v591_v39  ;;  %v1596_v40 = vld [vmem:[%s2717_s1 + $0x38] sm:$0xff] }
 0x1c7   : > { %v600_v45 = vadd.f32 1e-05, %v596_v41 }
 0x1c8   : > { %v599_v46 = vadd.f32 1e-05, %v595_v43 }
 0x1c9   : > { %2156 = vrsqrt.f32 %v600_v45 }
 0x1ca   : > { %2158 = vrsqrt.f32 %v599_v46 }
 0x1cf   : > { %v2153_v49 = vpop.eup %2152 }
 0x1d0   : > { %v2155_v50 = vpop.eup %2154  ;;  %v626_v51 = vmul.f32 %v2153_v49, %v613_v47 }
 0x1d1   : > { %v625_v52 = vmul.f32 %v2155_v50, %v608_v42 }
 0x1d2   : > { %v630_v54 = vmul.f32 %v626_v51, %v582_v3 }
 0x1d3   : > { %v2157_v55 = vpop.eup %2156  ;;  %1860 = vmatprep.mubr.msk.f32.mxu1 %vm657_vm14, %v625_v52  ;;  %v629_v59 = vmul.f32 %v625_v52, %v581_v11 }
 0x1d4   : > { %v2159_v60 = vpop.eup %2158  ;;  %1861 = vmatmul.mubr.msk.f32.vlgmr.msra.gmra.mrb[4].mxu1 %vm657_vm14, %v626_v51  ;;  %v628_v63 = vmul.f32 %v2157_v55, %v623_v53  ;;  %v654_v5 = vsub.f32 %v641_v56, %v630_v54 }
 0x1d5   : > { %v627_v0 = vmul.f32 %v2159_v60, %v618_v44  ;;  %v653_v1 = vsub.f32 %v636_v48, %v629_v59 }
 0x1d6   : > { %v632_v6 = vmul.f32 %v628_v63, %v584_v24 }
 0x1d7   : > { %1863 = vmatprep.mubr.msk.f32.mxu1 %vm657_vm14, %v627_v0  ;;  %1870 = vmatprep.mubr.msk.f32.mxu0 %vm657_vm14, %v653_v1  ;;  %v631_v7 = vmul.f32 %v627_v0, %v583_v28 }
 0x1d8   : > { %1864 = vmatmul.mubr.msk.f32.gmra.mrb[6].mxu1 %vm657_vm14, %v628_v63  ;;  %1871 = vmatmul.mubr.msk.f32.vlgmr.msra.gmra.mrb[8].mxu0 %vm657_vm14, %v654_v5  ;;  %v656_v3 = vsub.f32 %v651_v9, %v632_v6  ;;  %v1178_v9 = vpop.permute.xlu0 %1177 }
 0x1d9   : > { %v655_v2 = vsub.f32 %v646_v8, %v631_v7  ;;  %2069 = vmatpush3.bf16.msk.msra.mxu0 %vm2265_vm12, %v2180_v18  ;;  %1884 = vmatprep.mubr.msk.f32.mxu1 %vm879_vm2, %v1593_v4 }
 0x1da   : > { %2071 = vmatprep.subr.msk.bf16.mxu0 %vm2288_vm4, %v2180_v18 }
 0x1db   : > { %1873 = vmatprep.mubr.msk.f32.mxu0 %vm657_vm14, %v655_v2 }
 0x1dc   : > { %1874 = vmatmul.mubr.msk.f32.gmra.mrb[10].mxu0 %vm657_vm14, %v656_v3  ;;  %v1183_v3 = vpop.permute.xlu1 %1182 }
 0x1dd   : > { %2073 = vmatpush3.bf16.msk.msra.mxu0 %vm2288_vm4, %v2180_v18 }
 0x1de   : > { %2075 = vmatprep.subr.msk.bf16.mxu0 %vm2741_vm15, %v2180_v18 }
 0x1e1   : > { %2077 = vmatpush3.bf16.msk.msra.mxu0 %vm2741_vm15, %v2180_v18 }
 0x1e2   : > { %2079 = vmatprep.subr.msk.bf16.mxu0 %vm2326_vm3, %v2180_v18 }
 0x1e5   : > { %2081 = vmatpush3.bf16.msk.msra.mxu0 %vm2326_vm3, %v2180_v18 }
 0x1e6   : > { %2083 = vmatprep.subr.msk.bf16.mxu0 %vm2348_vm11, %v2180_v18 }
 0x1e9   : > { %2085 = vmatpush3.bf16.msk.msra.mxu0 %vm2348_vm11, %v2180_v18 }
 0x1ea   : > { %2087 = vmatprep.subr.msk.bf16.mxu0 %vm2367_vm0, %v2180_v18 }
 0x1ed   : > { %2089 = vmatpush3.bf16.msk.msra.mxu0 %vm2367_vm0, %v2180_v18 }
 0x1ee   : > { %2091 = vmatprep.subr.msk.bf16.mxu0 %vm2387_vm10, %v2180_v18 }
 0x1f1   : > { %2093 = vmatpush3.bf16.msk.msra.mxu0 %vm2387_vm10, %v2180_v18 }
 0x1f2   : > { %2095 = vmatprep.subr.msk.bf16.mxu0 %vm2406_vm1, %v2180_v18 }
 0x1f5   : > { %2097 = vmatpush3.bf16.msk.msra.mxu0 %vm2406_vm1, %v2180_v18 }
 0x1f6   : > { %2131 = vmatprep.subr.msk.bf16.mxu0 %vm2519_vm13, %v2180_v18 }
 0x2a7   : > { %v1862_v11 = vpop.f32.mrb[4].mxu1 }
 0x2a8   : > { %v853_v12 = vmul.f32 %v1862_v11, %v2491_v57  ;;  %v736_v13 = vpop.f32.mrb[5].mxu1 }
 0x2a9   : > { %v852_v14 = vmul.f32 %v736_v13, %v2493_v58  ;;  %v1193_v13 = vpop.permute.xlu1 %1192 }
 0x2ab   : > { %v1865_v15 = vpop.f32.mrb[6].mxu1  ;;  %v1872_v17 = vpop.f32.mrb[8].mxu0 }
 0x2ac   : > { %v855_v19 = vmul.f32 %v1865_v15, %v2501_v61  ;;  %v857_v21 = vadd.f32 %v1872_v17, %v853_v12  ;;  %v746_v22 = vpop.f32.mrb[7].mxu1  ;;  %v833_v24 = vpop.f32.mrb[9].mxu0  ;;  %v1594_v61 = vld [vmem:[%s2717_s1 + $0x28] sm:$0xff] }
 0x2ad   : > { %v854_v25 = vmul.f32 %v746_v22, %v2503_v62  ;;  %v856_v27 = vadd.f32 %v852_v14, %v833_v24  ;;  %v1595_v62 = vld [vmem:[%s2717_s1 + $0x30] sm:$0xff]  ;;  %v1188_v12 = vpop.permute.xlu0 %1187 }
 0x2ae   : > { %v861_v28 = vmax.f32 %v857_v21, 0.0 }
 0x2af   : > { %v860_v30 = vmax.f32 %v856_v27, 0.0  ;;  %v1875_v31 = vpop.f32.mrb[10].mxu0 }
 0x2b0   : > { %v859_v35 = vadd.f32 %v1875_v31, %v855_v19  ;;  %v843_v36 = vpop.f32.mrb[11].mxu0 }
 0x2b1   : > { %v2058_v37 = vpack.c.bf16 %v861_v28, %v860_v30  ;;  %v858_v57 = vadd.f32 %v854_v25, %v843_v36  ;;  %v1206_v21 = vpop.permute.xlu0 %1205  ;;  %v1211_v25 = vpop.permute.xlu1 %1210 }
 0x2b2   : > { %v863_v38 = vmax.f32 %v859_v35, 0.0 }
 0x2b3   : > { %v862_v39 = vmax.f32 %v858_v57, 0.0  ;;  %2059 = vmatprep.subr.bf16.mxu1 %v2058_v37 }
 0x2b4   : > { %2061 = vmatpush3.bf16.msra.mxu1 %v2058_v37 }
 0x2b5   : > { %v2062_v58 = vpack.c.bf16 %v863_v38, %v862_v39  ;;  %v1216_v57 = vpop.permute.xlu0 %1215  ;;  %v1221_v38 = vpop.permute.xlu1 %1220 }
 0x2b7   : > { %2063 = vmatprep.subr.bf16.mxu1 %v2062_v58 }
 0x2b8   : > { %2065 = vmatpush3.bf16.msra.mxu1 %v2062_v58 }
 0x2b9   : > { %2099 = vmatprep.subr.msk.bf16.mxu1 %vm2265_vm12, %v2180_v18 }
 0x2bb   : > { %1885 = vmatmul.mubr.msk.f32.vlgmr.msra.gmra.mrb[8].mxu1 %vm879_vm2, %v1594_v61 }
 0x2bc   : > { %1887 = vmatprep.mubr.msk.f32.mxu1 %vm879_vm2, %v1595_v62  ;;  %2101 = vmatpush3.bf16.msk.msra.mxu1 %vm2265_vm12, %v2180_v18 }
 0x2bd   : > { %2103 = vmatprep.subr.msk.bf16.mxu1 %vm2288_vm4, %v2180_v18 }
 0x2bf   : > { %1888 = vmatmul.mubr.msk.f32.gmra.mrb[10].mxu1 %vm879_vm2, %v1596_v40 }
 0x2c0   : > { %2105 = vmatpush3.bf16.msk.msra.mxu1 %vm2288_vm4, %v2180_v18 }
 0x2c1   : > { %2107 = vmatprep.subr.msk.bf16.mxu1 %vm2741_vm15, %v2180_v18 }
 0x2c4   : > { %2109 = vmatpush3.bf16.msk.msra.mxu1 %vm2741_vm15, %v2180_v18 }
 0x2c5   : > { %2111 = vmatprep.subr.msk.bf16.mxu1 %vm2326_vm3, %v2180_v18 }
 0x2c8   : > { %2113 = vmatpush3.bf16.msk.msra.mxu1 %vm2326_vm3, %v2180_v18 }
 0x2c9   : > { %2115 = vmatprep.subr.msk.bf16.mxu1 %vm2348_vm11, %v2180_v18 }
 0x2cc   : > { %2117 = vmatpush3.bf16.msk.msra.mxu1 %vm2348_vm11, %v2180_v18 }
 0x2cd   : > { %2119 = vmatprep.subr.msk.bf16.mxu1 %vm2367_vm0, %v2180_v18 }
 0x2d0   : > { %2121 = vmatpush3.bf16.msk.msra.mxu1 %vm2367_vm0, %v2180_v18 }
 0x2d1   : > { %2123 = vmatprep.subr.msk.bf16.mxu1 %vm2387_vm10, %v2180_v18 }
 0x2d4   : > { %2125 = vmatpush3.bf16.msk.msra.mxu1 %vm2387_vm10, %v2180_v18 }
 0x2d5   : > { %2127 = vmatprep.subr.msk.bf16.mxu1 %vm2406_vm1, %v2180_v18 }
 0x2d8   : > { %2129 = vmatpush3.bf16.msk.msra.mxu1 %vm2406_vm1, %v2180_v18 }
 0x2d9   : > { %2138 = vmatprep.subr.msk.bf16.mxu1 %vm2519_vm13, %v2180_v18 }
 0x38e   : > { %v2665_v16 = vpop.f32.mrb[8].mxu1 }
 0x38f   : > { %v2667_v20 = vpop.f32.mrb[9].mxu1  ;;  %v1063_v26 = vmul.f32 %v2665_v16, %v2665_v16 }
 0x390   : > { %v1062_v23 = vmul.f32 %v2667_v20, %v2667_v20  ;;  %1922 = vmatprep.mubr.f32.mxu0 %v2667_v20 }
 0x391   : > { %1923 = vmatmul.mubr.f32.vlgmr.msra.gmra.mrb[12].mxu0 %v2665_v16 }
 0x392   : > { %v2675_v29 = vpop.f32.mrb[10].mxu1  ;;  %1960 = vmatprep.mubr.f32.mxu1 %v1062_v23  ;;  %2133 = vmatpush3.bf16.msk.msra.mxu0 %vm2519_vm13, %v2180_v18 }
 0x393   : > { %v2680_v32 = vpop.f32.mrb[11].mxu1  ;;  %1961 = vmatmul.mubr.f32.vlgmr.msra.gmra.mrb[12].mxu1 %v1063_v26  ;;  %2135 = vmatprep.subr.msk.bf16.mxu0 %vm2519_vm13, %v2180_v18  ;;  %v1065_v34 = vmul.f32 %v2675_v29, %v2675_v29 }
 0x394   : > { %v1064_v33 = vmul.f32 %v2680_v32, %v2680_v32  ;;  %1925 = vmatprep.mubr.f32.mxu0 %v2680_v32  ;;  %2139 = vmatpush3.bf16.msk.msra.mxu1 %vm2519_vm13, %v2180_v18 }
 0x395   : > { %1926 = vmatmul.mubr.f32.gmra.mrb[14].mxu0 %v2675_v29 }
 0x396   : > { %1963 = vmatprep.mubr.f32.mxu1 %v1064_v33 }
 0x397   : > { %1964 = vmatmul.mubr.f32.gmra.mrb[14].mxu1 %v1065_v34 }
 0x464   : > { %v1924_v41 = vpop.f32.mrb[12].mxu0 }
 0x465   : > { %v1152_v42 = vmul.f32 0.125, %v1924_v41  ;;  %v1043_v43 = vpop.f32.mrb[13].mxu0  ;;  %v1441_v41 = vpop.permute.xlu0 %1440 }
 0x466   : > { %v1151_v44 = vmul.f32 0.125, %v1043_v43  ;;  %v1962_v45 = vpop.f32.mrb[12].mxu1 }
 0x467   : > { %v1160_v46 = vmul.f32 %v1152_v42, %v1152_v42  ;;  %v1156_v47 = vmul.f32 0.125, %v1962_v45  ;;  %v1132_v48 = vpop.f32.mrb[13].mxu1 }
 0x468   : > { %v1159_v49 = vmul.f32 %v1151_v44, %v1151_v44  ;;  %v1155_v50 = vmul.f32 0.125, %v1132_v48  ;;  %v1927_v51 = vpop.f32.mrb[14].mxu0 }
 0x469   : > { %v1164_v52 = vsub.f32 %v1156_v47, %v1160_v46  ;;  %v1154_v53 = vmul.f32 0.125, %v1927_v51  ;;  %v1053_v54 = vpop.f32.mrb[15].mxu0 }
 0x46a   : > { %v1163_v55 = vsub.f32 %v1155_v50, %v1159_v49  ;;  %v1153_v56 = vmul.f32 0.125, %v1053_v54  ;;  %v1965_v59 = vpop.f32.mrb[14].mxu1  ;;  %v1446_v50 = vpop.permute.xlu1 %1445 }
 0x46b   : > { %v1168_v60 = vadd.f32 1e-05, %v1164_v52  ;;  %v1162_v63 = vmul.f32 %v1154_v53, %v1154_v53  ;;  %v1158_v0 = vmul.f32 0.125, %v1965_v59  ;;  %v1142_v1 = vpop.f32.mrb[15].mxu1 }
 0x46c   : > { %v1167_v5 = vadd.f32 1e-05, %v1163_v55  ;;  %v1161_v6 = vmul.f32 %v1153_v56, %v1153_v56  ;;  %v1157_v7 = vmul.f32 0.125, %v1142_v1 }
 0x46d   : > { %2160 = vrsqrt.f32 %v1168_v60  ;;  %v1166_v8 = vsub.f32 %v1158_v0, %v1162_v63 }
 0x46e   : > { %2162 = vrsqrt.f32 %v1167_v5  ;;  %v1165_v2 = vsub.f32 %v1157_v7, %v1161_v6 }
 0x46f   : > { %v1170_v4 = vadd.f32 1e-05, %v1166_v8 }
 0x470   : > { %v1169_v11 = vadd.f32 1e-05, %v1165_v2 }
 0x471   : > { %2164 = vrsqrt.f32 %v1170_v4 }
 0x472   : > { %2166 = vrsqrt.f32 %v1169_v11 }
 0x477   : > { %v2161_v14 = vpop.eup %2160 }
 0x478   : > { %v2163_v15 = vpop.eup %2162  ;;  %v1196_v17 = vmul.f32 %v2161_v14, %v1183_v3 }
 0x479   : > { %v1195_v19 = vmul.f32 %v2163_v15, %v1178_v9 }
 0x47a   : > { %v1200_v22 = vmul.f32 %v1196_v17, %v1152_v42 }
 0x47b   : > { %v2165_v24 = vpop.eup %2164  ;;  %1970 = vmatprep.mubr.msk.f32.mxu0 %vm657_vm14, %v1195_v19  ;;  %v1199_v27 = vmul.f32 %v1195_v19, %v1151_v44 }
 0x47c   : > { %v2167_v28 = vpop.eup %2166  ;;  %1971 = vmatmul.mubr.msk.f32.vlgmr.msra.gmra.mrb[16].mxu0 %vm657_vm14, %v1196_v17  ;;  %v1198_v30 = vmul.f32 %v2165_v24, %v1193_v13  ;;  %v1224_v61 = vsub.f32 %v1211_v25, %v1200_v22 }
 0x47d   : > { %2137 = vmatpush3.bf16.msk.msra.mxu0 %vm2519_vm13, %v2180_v18  ;;  %v1197_v31 = vmul.f32 %v2167_v28, %v1188_v12  ;;  %v1223_v36 = vsub.f32 %v1206_v21, %v1199_v27 }
 0x47e   : > { %v1202_v35 = vmul.f32 %v1198_v30, %v1154_v53 }
 0x47f   : > { %1973 = vmatprep.mubr.msk.f32.mxu0 %vm657_vm14, %v1197_v31  ;;  %v1201_v37 = vmul.f32 %v1197_v31, %v1153_v56 }
 0x480   : > { %1974 = vmatmul.mubr.msk.f32.gmra.mrb[18].mxu0 %vm657_vm14, %v1198_v30  ;;  %v1226_v58 = vsub.f32 %v1221_v38, %v1202_v35 }
 0x481   : > { %1980 = vmatprep.mubr.msk.f32.mxu0 %vm657_vm14, %v1223_v36  ;;  %v1225_v39 = vsub.f32 %v1216_v57, %v1201_v37 }
 0x483   : > { %1983 = vmatprep.mubr.msk.f32.mxu1 %vm657_vm14, %v1225_v39 }
 0x484   : > { %1981 = vmatmul.mubr.msk.f32.vlgmr.msra.gmra.mrb[20].mxu0 %vm657_vm14, %v1224_v61  ;;  %1984 = vmatmul.mubr.msk.f32.vlgmr.msra.gmra.mrb[16].mxu1 %vm657_vm14, %v1226_v58 }
 0x54f   : > { %v1972_v18 = vpop.f32.mrb[16].mxu0 }
 0x550   : > { %v1422_v10 = vmul.f32 %v1972_v18, %v2665_v16  ;;  %v1305_v62 = vpop.f32.mrb[17].mxu0 }
 0x551   : > { %v1421_v40 = vmul.f32 %v1305_v62, %v2667_v20 }
 0x553   : > { %v1975_v23 = vpop.f32.mrb[18].mxu0 }
 0x554   : > { %v1424_v26 = vmul.f32 %v1975_v23, %v2675_v29  ;;  %v1315_v33 = vpop.f32.mrb[19].mxu0  ;;  %v1451_v29 = vpop.permute.xlu0 %1450 }
 0x555   : > { %v1423_v34 = vmul.f32 %v1315_v33, %v2680_v32  ;;  %v1456_v32 = vpop.permute.xlu1 %1455 }
 0x557   : > { %v1982_v42 = vpop.f32.mrb[20].mxu0  ;;  %v1985_v43 = vpop.f32.mrb[16].mxu1 }
 0x558   : > { %v1426_v44 = vadd.f32 %v1982_v42, %v1422_v10  ;;  %v1428_v45 = vadd.f32 %v1985_v43, %v1424_v26  ;;  %v1402_v46 = vpop.f32.mrb[21].mxu0  ;;  %v1412_v47 = vpop.f32.mrb[17].mxu1 }
 0x559   : > { %v1425_v48 = vadd.f32 %v1421_v40, %v1402_v46  ;;  %v1427_v49 = vadd.f32 %v1423_v34, %v1412_v47  ;;  %v1474_v9 = vpop.permute.xlu0 %1473 }
 0x55a   : > { %v1430_v16 = vmax.f32 %v1426_v44, 0.0  ;;  %v1432_v53 = vmax.f32 %v1428_v45, 0.0 }
 0x55b   : > { %v1429_v51 = vmax.f32 %v1425_v48, 0.0  ;;  %v1431_v52 = vmax.f32 %v1427_v49, 0.0 }
 0x55c   : > { %v1459_v20 = vmul.f32 %v1446_v50, %v1430_v16  ;;  %v1461_v59 = vmul.f32 %v1456_v32, %v1432_v53 }
 0x55d   : > { %v1458_v54 = vmul.f32 %v1441_v41, %v1429_v51  ;;  %v1460_v56 = vmul.f32 %v1451_v29, %v1431_v52 }
 0x55f   : > { %v1462_v55 = vadd.f32 %v1459_v20, %v1458_v54 }
 0x561   : > { %v1463_v60 = vadd.f32 %v1462_v55, %v1460_v56 }
 0x563   : > { %v1464_v63 = vadd.f32 %v1463_v60, %v1461_v59 }
 0x565   : > { %v1465_v0 = vrot.slane %v1464_v63, 4 }
 0x567   : > { %v1466_v1 = vadd.f32 %v1465_v0, %v1464_v63 }
 0x569   : > { %v1467_v5 = vrot.slane %v1466_v1, 2 }
 0x56b   : > { %v1468_v6 = vadd.f32 %v1467_v5, %v1466_v1 }
 0x56d   : > { %v1469_v7 = vrot.slane %v1468_v6, 1 }
 0x56f   : > { %v1470_v8 = vadd.f32 %v1469_v7, %v1468_v6 }
 0x571   : > { %v1476_v2 = vadd.f32 %v1474_v9, %v1470_v8 }
 0x573   : > { %v1477_v3 = vand.u32 2147483647, %v1476_v2  ;;  %vm1483_vm12 = vcmp.ge.f32.partialorder %v1476_v2, 0.0 }
 0x575   : > { %v1478_v4 = vsub.f32 0.0, %v1477_v3 }
 0x577   : > { %v1479_v11 = vmul.f32 1.442695, %v1478_v4 }
 0x579   : > { %2168 = vpow2.f32 %v1479_v11 }
 0x583   : > { %v2169_v12 = vpop.eup %2168 }
 0x584   : > { %v1481_v13 = vadd.f32 1.0, %v2169_v12 }
 0x586   : > { %2170 = vrcp.f32 %v1481_v13 }
 0x590   : > { %v2171_v14 = vpop.eup %2170 }
 0x591   : > { %v1484_v15 = vmul.f32 %v2171_v14, %v2169_v12 }
 0x593   : > { %v1485_v17 = vsel %vm1483_vm12, %v2171_v14, %v1484_v15 }
 0x594   : > { %1486 = vst [vmem:[%s190_s7] sm:$0x1] %v1485_v17 }
 0x595 PF: > { %s14_s15 = sadd.s32 1, %s2178_s15  }
 0x596   : > { %p11_p4 = scmp.ge.s32.totalorder %s14_s15, 4  }
 0x598   :  { %13 = sbr.rel (!%p11_p4) target bundleno = 1 (0x1), region = 70 }

</bundles_post_ra>
